<compile_context>
chip_gen: v6e
topology: v6e:2x2x1
jax: 0.10.0
libtpu: 0.0.40
codegen_flags: <defaults>
</compile_context>

<pallas_src>
import math
import functools

import jax
import jax.numpy as jnp
from jax.experimental import pallas as pl
from jax.experimental.pallas import tpu as pltpu


_VMEM_LIMIT_BYTES = 32 * 1024 * 1024   # explicit scoped-VMEM budget (v5e/v6e/v7x safe)


def _pick_kv_tile(A):
    """Largest lane-friendly KV tile that evenly divides the cache length."""
    for t in (512, 256, 128):
        if A % t == 0:
            return t
    return A


# ----------------------------------------------------------------------------
# Kernels
# ----------------------------------------------------------------------------
def _kv_init_kernel(embed_ref, wkv_ref, k_ref, v_ref):
    """Per-batch KV-cache projection: one lane-dense (A,E)x(E,2E) MXU matmul.

    embed_ref : (A, E)      bf16
    wkv_ref   : (E, 2E)     bf16   [K columns | V columns]
    k_ref     : (H, hd, A)  bf16   head-major, pre-transposed for QK^T
    v_ref     : (H, A, hd)  bf16
    """
    E = wkv_ref.shape[0]
    H, hd, A = k_ref.shape
    kv = jnp.dot(embed_ref[...], wkv_ref[...],
                 preferred_element_type=jnp.float32)                  # (A, 2E) f32
    k = kv[:, :E].reshape(A, H, hd)
    v = kv[:, E:].reshape(A, H, hd)
    # Head-major relayouts, paid once at init (never in the per-step forward).
    k = jnp.transpose(k, (1, 0, 2))                                   # (H, A, hd)
    k_ref[...] = jnp.swapaxes(k, 1, 2).astype(k_ref.dtype)            # (H, hd, A)
    v_ref[...] = jnp.transpose(v, (1, 0, 2)).astype(v_ref.dtype)      # (H, A, hd)


def _mha_fwd_kernel(*refs, has_mask):
    """Per-(batch, kv-tile) forward step with flash-style online softmax."""
    if has_mask:
        (q_ref, k_ref, v_ref, wq_ref, wout_ref, mask_ref,
         o_ref, qh_sc, m_sc, l_sc, acc_sc) = refs
    else:
        (q_ref, k_ref, v_ref, wq_ref, wout_ref,
         o_ref, qh_sc, m_sc, l_sc, acc_sc) = refs
        mask_ref = None

    H, hd, _ = k_ref.shape
    Lq, E = q_ref.shape
    a = pl.program_id(1)

    @pl.when(a == 0)
    def _init():
        # Q projection once per batch element (reused across all KV tiles).
        # 1/sqrt(head_dim) is pre-folded into wq by the wrapper.
        q = jnp.dot(q_ref[...], wq_ref[...],
                    preferred_element_type=jnp.float32)               # (Lq, E) f32
        qh_sc[...] = jnp.transpose(q.reshape(Lq, H, hd),
                                   (1, 0, 2)).astype(qh_sc.dtype)     # (H, Lq, hd)
        m_sc[...] = jnp.full_like(m_sc, -jnp.inf)
        l_sc[...] = jnp.zeros_like(l_sc)
        acc_sc[...] = jnp.zeros_like(acc_sc)

    # Scores for this KV tile: head-batched, K already (H, hd, tA).
    s = jnp.einsum('hqd,hdk->hqk', qh_sc[...], k_ref[...],
                   preferred_element_type=jnp.float32)                # (H, Lq, tA) f32
    if has_mask:
        # masked_fill; large finite negative avoids NaN on fully-masked rows.
        s = jnp.where(mask_ref[...][None, :, :] != 0, jnp.float32(-1e30), s)

    m_new = jnp.maximum(m_sc[...], jnp.max(s, axis=-1, keepdims=True))
    alpha = jnp.exp(m_sc[...] - m_new)
    p = jnp.exp(s - m_new)
    # TODO(synk): training-mode dropout on attention weights not implemented
    #             (eval()/inference semantics).
    l_sc[...] = alpha * l_sc[...] + jnp.sum(p, axis=-1, keepdims=True)
    acc_sc[...] = alpha * acc_sc[...] + jnp.einsum(
        'hqk,hkd->hqd', p.astype(v_ref.dtype), v_ref[...],
        preferred_element_type=jnp.float32)                           # (H, Lq, hd) f32
    m_sc[...] = m_new

    @pl.when(a == pl.num_programs(1) - 1)
    def _finalize():
        # Deferred softmax divide (single EUP approx reciprocal), then ONE
        # lane-dense (Lq,E)x(E,E) output-projection matmul (no per-head loop).
        ctx = acc_sc[...] * pl.reciprocal(l_sc[...], approx=True)     # (H, Lq, hd)
        ctx = jnp.transpose(ctx, (1, 0, 2)).reshape(Lq, E)            # (Lq, E)
        o_ref[...] = jnp.dot(ctx.astype(jnp.bfloat16), wout_ref[...],
                             preferred_element_type=jnp.float32
                             ).astype(o_ref.dtype)


# ----------------------------------------------------------------------------
# Module wrapper
# ----------------------------------------------------------------------------
class MultiHeadAttentionCacheKV:
    def __init__(self, d_model, n_head, dropout=0.1, *, key):
        assert d_model % n_head == 0, "d_model must be divisible by n_head"
        self.d_model = d_model
        self.n_head = n_head
        self.head_dim = d_model // n_head
        self.dropout = dropout  # unused (eval semantics)

        E, hd = d_model, self.head_dim
        k1, k2, k3 = jax.random.split(key, 3)
        bound = 1.0 / math.sqrt(d_model)  # nn.Linear default uniform bound
        # master weights stored f32 as (in, out) == torch_weight.T
        self.W_kv = jax.random.uniform(k1, (E, 2 * E), jnp.float32, -bound, bound)
        self.W_q = jax.random.uniform(k2, (E, E), jnp.float32, -bound, bound)
        self.W_out = jax.random.uniform(k3, (E, E), jnp.float32, -bound, bound)

        # Kernel-side bf16 weights (prepared once on host):
        self._Wkv = self.W_kv.astype(jnp.bfloat16)                    # (E, 2E)
        self._Wq = (self.W_q / math.sqrt(hd)).astype(jnp.bfloat16)    # scale folded
        self._Wout = self.W_out.astype(jnp.bfloat16)                  # (E, E)

        self.glimpse_K = None   # (B, H, hd, A) bf16
        self.glimpse_V = None   # (B, H, A, hd) bf16

    def init(self, embed):
        B, A, E = embed.shape
        assert E == self.d_model
        H, hd = self.n_head, self.head_dim
        k, v = pl.pallas_call(
            _kv_init_kernel,
            grid=(B,),
            in_specs=[
                pl.BlockSpec((None, A, E), lambda b: (b, 0, 0)),
                pl.BlockSpec((E, 2 * E), lambda b: (0, 0)),
            ],
            out_specs=[
                pl.BlockSpec((None, H, hd, A), lambda b: (b, 0, 0, 0)),
                pl.BlockSpec((None, H, A, hd), lambda b: (b, 0, 0, 0)),
            ],
            out_shape=[
                jax.ShapeDtypeStruct((B, H, hd, A), jnp.bfloat16),
                jax.ShapeDtypeStruct((B, H, A, hd), jnp.bfloat16),
            ],
            compiler_params=pltpu.CompilerParams(
                dimension_semantics=("parallel",),
                vmem_limit_bytes=_VMEM_LIMIT_BYTES),
        )(embed.astype(jnp.bfloat16), self._Wkv)
        self.glimpse_K, self.glimpse_V = k, v

    def __call__(self, q_embed, mask=None):
        assert self.glimpse_K is not None, "call init(embed) first"
        B, Lq, E = q_embed.shape
        H, hd = self.n_head, self.head_dim
        A = self.glimpse_K.shape[-1]
        has_mask = mask is not None

        tA = _pick_kv_tile(A)
        n_kv = A // tA
        kern = functools.partial(_mha_fwd_kernel, has_mask=has_mask)

        in_specs = [
            pl.BlockSpec((None, Lq, E), lambda b, a: (b, 0, 0)),         # q_embed bf16
            pl.BlockSpec((None, H, hd, tA), lambda b, a: (b, 0, 0, a)),  # K tile
            pl.BlockSpec((None, H, tA, hd), lambda b, a: (b, 0, a, 0)),  # V tile
            # TODO(synk): for very large d_model, single-buffer these
            # constant-index weight blocks (pipeline_mode=pl.Buffered(1)) or
            # tile W_out's E output dim; and consider int8 (v5e/v6e) / fp8
            # (v7x) KV-cache quantization + batch-blocking for tiny Lq.
            pl.BlockSpec((E, E), lambda b, a: (0, 0)),                   # W_q (scaled)
            pl.BlockSpec((E, E), lambda b, a: (0, 0)),                   # W_out
        ]
        args = [q_embed.astype(jnp.bfloat16), self.glimpse_K, self.glimpse_V,
                self._Wq, self._Wout]
        if has_mask:
            in_specs.append(pl.BlockSpec((None, Lq, tA), lambda b, a: (b, 0, a)))
            args.append(mask.astype(jnp.int8))

        out = pl.pallas_call(
            kern,
            grid=(B, n_kv),
            in_specs=in_specs,
            out_specs=pl.BlockSpec((None, Lq, E), lambda b, a: (b, 0, 0)),
            out_shape=jax.ShapeDtypeStruct((B, Lq, E), jnp.float32),
            scratch_shapes=[
                pltpu.VMEM((H, Lq, hd), jnp.bfloat16),   # projected Q (reused per KV tile)
                pltpu.VMEM((H, Lq, 1), jnp.float32),     # running max
                pltpu.VMEM((H, Lq, 1), jnp.float32),     # running denom
                pltpu.VMEM((H, Lq, hd), jnp.float32),    # running context
            ],
            compiler_params=pltpu.CompilerParams(
                dimension_semantics=("parallel", "arbitrary"),
                vmem_limit_bytes=_VMEM_LIMIT_BYTES),
        )(*args)
        return out


# ----------------------------------------------------------------------------
# Pure-JAX f32 reference (mirrors the PyTorch forward exactly)
# ----------------------------------------------------------------------------
def _reference(mod, embed, q_embed, mask=None):
    B, A, E = embed.shape
    H, hd = mod.n_head, mod.head_dim
    kv = embed @ mod.W_kv
    K, V = kv[..., :E], kv[..., E:]
    K = K.reshape(B, A, H, hd).transpose(0, 2, 3, 1)   # (B,H,hd,A)
    V = V.reshape(B, A, H, hd).transpose(0, 2, 1, 3)   # (B,H,A,hd)
    Q = (q_embed @ mod.W_q).reshape(B, -1, H, hd).transpose(0, 2, 1, 3)  # (B,H,Lq,hd)
    score = jnp.einsum("bhqd,bhdk->bhqk", Q, K) / math.sqrt(hd)
    if mask is not None:
        score = jnp.where(mask[:, None, :, :], -jnp.inf, score)
    attn = jax.nn.softmax(score, axis=-1)
    ctx = jnp.einsum("bhqk,bhkd->bhqd", attn, V)
    ctx = ctx.transpose(0, 2, 1, 3).reshape(B, -1, E)
    return ctx @ mod.W_out


# ----------------------------------------------------------------------------
if __name__ == "__main__":
    B, A, Lq = 2, 8, 8
    d_model, n_head = 32, 4

    root = jax.random.PRNGKey(0)
    k_w, k_embed, k_q = jax.random.split(root, 3)

    mod = MultiHeadAttentionCacheKV(d_model, n_head, dropout=0.1, key=k_w)

    embed = jax.random.normal(k_embed, (B, A, d_model), jnp.float32)
    q_embed = jax.random.normal(k_q, (B, Lq, d_model), jnp.float32)

    mod.init(embed)                                   # KV cache via Pallas kernel
    jax.block_until_ready((mod.glimpse_K, mod.glimpse_V))

    out = jax.block_until_ready(mod(q_embed, mask=None))
    ref = _reference(mod, embed, q_embed, mask=None)
    assert out.shape == (B, Lq, d_model)
    # bf16 MXU operands + approx reciprocal vs f32 reference -> bf16-level tolerance
    assert jnp.allclose(out, ref, rtol=3e-2, atol=3e-2), "mismatch vs reference (no mask)"

    # masked path (causal-style; no fully-masked rows)
    mask = jnp.broadcast_to(
        (jnp.arange(A)[None, :] > jnp.arange(Lq)[:, None])[None], (B, Lq, A))
    out_m = jax.block_until_ready(mod(q_embed, mask=mask))
    ref_m = _reference(mod, embed, q_embed, mask=mask)
    assert jnp.allclose(out_m, ref_m, rtol=3e-2, atol=3e-2), "mismatch vs reference (mask)"

    print("KERNEL_OK")
</pallas_src>

<mosaic_0001>
module attributes {stable_mosaic.version = 11 : i64} {
  func.func @_kv_init_kernel(%arg0: i32, %arg1: memref<1x8x32xbf16, #tpu.memory_space<vmem>>, %arg2: memref<32x64xbf16, #tpu.memory_space<vmem>>, %arg3: memref<1x4x8x8xbf16, #tpu.memory_space<vmem>>, %arg4: memref<1x4x8x8xbf16, #tpu.memory_space<vmem>>) attributes {dimension_semantics = [#tpu.dimension_semantics<parallel>], iteration_bounds = array<i64: 2>, scalar_prefetch = 0 : i64, scratch_operands = 0 : i64, tpu.core_type = #tpu.core_type<tc>, window_params = [{transform_indices = @transform_0, window_bounds = array<i64: 1, 8, 32>}, {pipeline_mode = #tpu.pipeline_mode<synchronous>, transform_indices = @transform_1, window_bounds = array<i64: 32, 64>}, {transform_indices = @transform_2, window_bounds = array<i64: 1, 4, 8, 8>}, {transform_indices = @transform_3, window_bounds = array<i64: 1, 4, 8, 8>}]} {
    %c0 = arith.constant 0 : index
    %c0_0 = arith.constant 0 : index
    %c0_1 = arith.constant 0 : index
    %0 = vector.load %arg1[%c0, %c0_0, %c0_1] : memref<1x8x32xbf16, #tpu.memory_space<vmem>>, vector<1x8x32xbf16>
    %1 = vector.shape_cast %0 : vector<1x8x32xbf16> to vector<8x32xbf16>
    %c0_2 = arith.constant 0 : index
    %c0_3 = arith.constant 0 : index
    %2 = vector.load %arg2[%c0_2, %c0_3] : memref<32x64xbf16, #tpu.memory_space<vmem>>, vector<32x64xbf16>
    %cst = arith.constant dense<0.000000e+00> : vector<8x64xf32>
    %3 = tpu.matmul %1, %2, %cst {dimension_numbers = #tpu.dot_dimension_numbers<[1], [0], [0], [1], [0, 0, 1, 1], [], []>} : vector<8x32xbf16>, vector<32x64xbf16>, vector<8x64xf32> -> vector<8x64xf32>
    %4 = vector.extract_strided_slice %3 {offsets = [0, 0], sizes = [8, 32], strides = [1, 1]} : vector<8x64xf32> to vector<8x32xf32>
    %5 = vector.shape_cast %4 : vector<8x32xf32> to vector<8x4x8xf32>
    %6 = vector.extract_strided_slice %3 {offsets = [0, 32], sizes = [8, 32], strides = [1, 1]} : vector<8x64xf32> to vector<8x32xf32>
    %7 = vector.shape_cast %6 : vector<8x32xf32> to vector<8x4x8xf32>
    %8 = tpu.transpose %5, [1, 0, 2] : vector<8x4x8xf32> -> vector<4x8x8xf32>
    %9 = tpu.transpose %8, [0, 2, 1] : vector<4x8x8xf32> -> vector<4x8x8xf32>
    %10 = arith.truncf %9 : vector<4x8x8xf32> to vector<4x8x8xbf16>
    %c0_4 = arith.constant 0 : index
    %c0_5 = arith.constant 0 : index
    %c0_6 = arith.constant 0 : index
    %c0_7 = arith.constant 0 : index
    %11 = vector.load %arg3[%c0_4, %c0_5, %c0_6, %c0_7] : memref<1x4x8x8xbf16, #tpu.memory_space<vmem>>, vector<1x4x8x8xbf16>
    %12 = vector.shape_cast %11 : vector<1x4x8x8xbf16> to vector<4x8x8xbf16>
    %13 = vector.shape_cast %10 : vector<4x8x8xbf16> to vector<1x4x8x8xbf16>
    tpu.vector_store %arg3[%c0_4, %c0_5, %c0_6, %c0_7], %13 {strides = array<i32>} : memref<1x4x8x8xbf16, #tpu.memory_space<vmem>>, vector<1x4x8x8xbf16>,
    %14 = tpu.transpose %7, [1, 0, 2] : vector<8x4x8xf32> -> vector<4x8x8xf32>
    %15 = arith.truncf %14 : vector<4x8x8xf32> to vector<4x8x8xbf16>
    %c0_8 = arith.constant 0 : index
    %c0_9 = arith.constant 0 : index
    %c0_10 = arith.constant 0 : index
    %c0_11 = arith.constant 0 : index
    %16 = vector.load %arg4[%c0_8, %c0_9, %c0_10, %c0_11] : memref<1x4x8x8xbf16, #tpu.memory_space<vmem>>, vector<1x4x8x8xbf16>
    %17 = vector.shape_cast %16 : vector<1x4x8x8xbf16> to vector<4x8x8xbf16>
    %18 = vector.shape_cast %15 : vector<4x8x8xbf16> to vector<1x4x8x8xbf16>
    tpu.vector_store %arg4[%c0_8, %c0_9, %c0_10, %c0_11], %18 {strides = array<i32>} : memref<1x4x8x8xbf16, #tpu.memory_space<vmem>>, vector<1x4x8x8xbf16>,
    return
  }
  func.func @transform_0(%arg0: i32) -> (i32, i32, i32) {
    %c0_i32 = arith.constant 0 : i32
    %c0_i32_0 = arith.constant 0 : i32
    %c0_i32_1 = arith.constant 0 : i32
    return %arg0, %c0_i32, %c0_i32_0 : i32, i32, i32
  }
  func.func @transform_1(%arg0: i32) -> (i32, i32) {
    %c0_i32 = arith.constant 0 : i32
    %c0_i32_0 = arith.constant 0 : i32
    %c0_i32_1 = arith.constant 0 : i32
    return %c0_i32, %c0_i32_0 : i32, i32
  }
  func.func @transform_2(%arg0: i32) -> (i32, i32, i32, i32) {
    %c0_i32 = arith.constant 0 : i32
    %c0_i32_0 = arith.constant 0 : i32
    %c0_i32_1 = arith.constant 0 : i32
    %c0_i32_2 = arith.constant 0 : i32
    return %arg0, %c0_i32, %c0_i32_0, %c0_i32_1 : i32, i32, i32, i32
  }
  func.func @transform_3(%arg0: i32) -> (i32, i32, i32, i32) {
    %c0_i32 = arith.constant 0 : i32
    %c0_i32_0 = arith.constant 0 : i32
    %c0_i32_1 = arith.constant 0 : i32
    %c0_i32_2 = arith.constant 0 : i32
    return %arg0, %c0_i32, %c0_i32_0, %c0_i32_1 : i32, i32, i32, i32
  }
}

</mosaic_0001>

<bundles_post_ra>
// kernel: tpu_custom_call.1
= control target key start
LH: loop header
LB: loop body
LE: loop exit
PB: predicated region body
PF: predicated region fallthrough
CT: control target
= control target key end

     0   :  { %9 = vsyncpa [#allocation3], 0  ;;  %s1437_s0 = inlined_call_operand.hbm [shape: bf16[2,8,32], index: 0, kind: input, shape index: {}]   ;;  %s1438_s1 = inlined_call_operand.hbm [shape: bf16[32,64], index: 1, kind: input, shape index: {}]   ;;  %s1439_s2 = inlined_call_operand.hbm [shape: bf16[2,4,8,8], index: 2, kind: output, shape index: {0}]   ;;  %s1440_s3 = inlined_call_operand.hbm [shape: bf16[2,4,8,8], index: 3, kind: output, shape index: {1}]  }
   0x1   :  { %11 = vsyncpa [#allocation3 + $0x1], 0 }
   0x2   :  { %12 = vsyncpa [#allocation6], 0 }
   0x3   :  { %13 = vsyncpa [#allocation4], 0 }
   0x4   :  { %15 = vsyncpa [#allocation4 + $0x1], 0 }
   0x5   :  { %16 = vsyncpa [#allocation9], 0 }
   0x6   :  { %18 = vsyncpa [#allocation9 + $0x1], 0  ;;  %s1182_s12 = smov 0   ;;  %s1184_s13 = smov 0  }
   0x7   :  { %s1186_s14 = smov 0   ;;  %s1188_s15 = smov 0  }
   0x8 LB: > { %s1203_s16 = sadd.s32 4294967295, %s1144_s15   ;;  %s863_s17 = sadd.s32 4294967294, %s1144_s15   ;;  %s1144_s15 = sphi %s1188_s15, %s1462_s15   ;;  %s1140_s14 = sphi %s1186_s14, %s1461_s14   ;;  %s1136_s13 = sphi %s1184_s13, %s1460_s13   ;;  %s1132_s12 = sphi %s1182_s12, %s1459_s12  }
   0x9   : > { %p44_p0 = scmp.ne.s32.totalorder %s1136_s13, %s1132_s12  ;;  %p1441_p1 = scmp.eq.s32.totalorder %s1203_s16, 0 }
   0xa   : > { %p95_p3 = scmp.eq.s32.totalorder %s863_s17, 1  ;;  %p864_p5 = scmp.ge.s32.totalorder %s1144_s15, 1 }
   0xb   : > { %p1212_p4 = por %p1441_p1, %p44_p0  ;;  %p128_p7 = scmp.lt.s32.totalorder %s1144_s15, 3 }
   0xc   : > { %p1217_p6 = por %p95_p3, %p44_p0  ;;  %s1146_s21 = smov [#allocation5]  }
   0xd   : > { %s1445_s18 = scalar_select %p1212_p4, 1, 0 }
   0xe   : > { %s1446_s19 = scalar_select %p1217_p6, 1, 0 }
   0xf   : > { %p1222_p8 = pnand %p864_p5, %p128_p7  ;;  %s140_s22 = sshll.u32 %s1146_s21, 4  ;;  %s141_s22 = int_to_ptr.vmem [resolvable:$true] %s140_s22 }
  0x10   : > { %s1236_s24 = sadd.s32 1, %s1144_s15   ;;  %s31_s25 = sadd.s32 1, %s1140_s14 }
  0x11   : > { %s1447_s20 = scalar_select %p1222_p8, 1, 0 }
  0x12   : > { %p912_p9 = pneg %p1222_p8  ;;  %s28_s26 = ssub.s32 %s1144_s15, %s1236_s24 }
  0x13   : > { %s1003_s27 = scalar_lea.vmem %s141_s22, 256  ;;  %p1011_p5 = scmp.lt.s32.totalorder %s141_s22, %s141_s22 }
  0x14   : > { %p1231_p11 = pnand %p912_p9, %p1441_p1  ;;  %p1004_p13 = scmp.ne.s32.totalorder %s141_s22, %s1003_s27 }
  0x15   : > { %p1012_p7 = scmp.lt.s32.totalorder %s1003_s27, %s1003_s27 }
  0x16   : > { %p994_p12 = pneg %p1231_p11 }
  0x17   : > { %p1013_p10 = por %p1012_p7, %p1011_p5 }
  0x18   : > { %p1006_p0 = pnand %p1004_p13, %p994_p12 }
  0x1a   : > { %p1007_p3 = pneg %p1006_p0 }
  0x1c   : > { %p1014_p2 = pnand %p1013_p10, %p1007_p3 }
  0x1e   : > { %1017 = shalt.err (!%p1014_p2)
}
  0x1f   : > { %s1147_s28 = smov 64   ;;  %s1148_s29 = smov 4  }
  0x20   : > { %915 = dma.hbm_to_vmem [thread:$0]  (!%p1231_p11), %s1438_s1, 256, %s141_s22, [#allocation6], %s1147_s28, %s1147_s28, %s1148_s29  }
  0x21   : > { %p29_p9 = scmp.eq.s32.totalorder %s28_s26, 0  ;;  %p38_p12 = scmp.ne.s32.totalorder %s1140_s14, %s1136_s13 }
  0x22   : > { %p39_p10 = scmp.eq.s32.totalorder %s1144_s15, 0  ;;  %p928_p2 = scmp.lt.s32.totalorder %s1144_s15, 2 }
  0x23   : > { %s1253_s5 = scalar_select %p29_p9, %s1140_s14, %s31_s25  }
  0x24   : > { %p40_p13 = por %p39_p10, %p38_p12  ;;  %p1449_p0 = scmp.eq.s32.totalorder %s1203_s16, 1 }
  0x25   : > { %s154_s7 = sand.u32 1, %s1140_s14   ;;  %s868_s8 = sshll.u32 %s1144_s15, 6 }
  0x26   : > { %p1257_p3 = por %p1449_p0, %p38_p12  ;;  %s867_s9 = sshll.u32 %s154_s7, 2 }
  0x27   : > { %s1266_s17 = scalar_lea.hbm %s1437_s0, %s868_s8  ;;  %s158_s21 = scalar_lea.vmem [#allocation2], %s867_s9 }
  0x28   : > { %s1450_s6 = scalar_select %p1257_p3, 1, 0 }
  0x29   : > { %s165_s22 = sshll.u32 %s158_s21, 4  ;;  %p1268_p11 = pnand %p928_p2, %p40_p13  ;;  %s166_s22 = int_to_ptr.vmem [resolvable:$true] %s165_s22 }
  0x2a   : > { %s155_s25 = scalar_lea.sflag [#allocation3], %s154_s7  ;;  %s1018_s26 = scalar_lea.hbm %s1266_s17, 64 }
  0x2b   : > { %p1019_p5 = scmp.ne.s32.totalorder %s1266_s17, %s1018_s26  ;;  %p1020_p7 = pneg %p1268_p11 }
  0x2c   : > { %s1023_s29 = scalar_lea.hbm %s1437_s0, 128  ;;  %p1024_p10 = scmp.lt.s32.totalorder %s1266_s17, %s1437_s0 }
  0x2d   : > { %p1021_p9 = pnand %p1020_p7, %p1019_p5  ;;  %p1025_p2 = scmp.lt.s32.totalorder %s1023_s29, %s1018_s26 }
  0x2f   : > { %p1022_p12 = pneg %p1021_p9  ;;  %p1026_p13 = por %p1025_p2, %p1024_p10 }
  0x31   : > { %p1027_p0 = pnand %p1026_p13, %p1022_p12 }
  0x33   : > { %1030 = shalt.err (!%p1027_p0)
}
  0x34   : > { %s1031_s8 = scalar_lea.vmem %s166_s22, 64  ;;  %s1149_s7 = smov [#allocation2]  }
  0x35   : > { %p1032_p1 = scmp.ne.s32.totalorder %s166_s22, %s1031_s8  ;;  %s1036_s9 = sshll.u32 %s1149_s7, 4  ;;  %s1037_s9 = int_to_ptr.vmem [resolvable:$false] %s1036_s9 }
  0x36   : > { %s1038_s10 = scalar_lea.vmem %s1037_s9, 128  ;;  %p1039_p5 = scmp.lt.s32.totalorder %s166_s22, %s1037_s9 }
  0x37   : > { %p1034_p6 = pnand %p1032_p1, %p1020_p7  ;;  %p1040_p9 = scmp.lt.s32.totalorder %s1038_s10, %s1031_s8 }
  0x39   : > { %p1035_p3 = pneg %p1034_p6  ;;  %p1041_p4 = por %p1040_p9, %p1039_p5 }
  0x3b   : > { %p1042_p8 = pnand %p1041_p4, %p1035_p3 }
  0x3d   : > { %1045 = shalt.err (!%p1042_p8)
}
  0x3e   : > { %919 = dma.hbm_to_vmem [thread:$0]  (!%p1268_p11), %s1266_s17, 64, %s166_s22, %s155_s25  }
  0x3f   : > { %p1452_p12 = scmp.ne.s32.totalorder %s1447_s20, 0 }
  0x40   : > { %s1289_s11 = sand.u32 (!%p1452_p12), 1, %s1136_s13   ;;  %p1453_p1 = scmp.ne.s32.totalorder (!%p1452_p12), %s1445_s18, 0 }
  0x41   : > { %174 = sbr.rel (%p1452_p12) target bundleno = 578 (0x242), region = 28  ;;  %s870_s21 = sshll.u32 (!%p1452_p12), %s1289_s11, 2 }
  0x42   : > { %s177_s26 = scalar_lea.sflag (!%p1452_p12), [#allocation3], %s1289_s11  ;;  %s180_s27 = scalar_lea.vmem (!%p1452_p12), [#allocation2], %s870_s21 }
  0x46   : > { %1115 = dma.done.wait (%p1453_p1), %s177_s26, 64  }
  0x47   : > { %1117 = vsyncadd (%p1453_p1), %s177_s26, 4294967232  ;;  %p1454_p4 = scmp.eq.s32.totalorder %s1203_s16, 0 }
  0x49   : > { %1119 = dma.done.wait (%p1454_p4), [#allocation6], 256   ;;  %p1455_p6 = pmov %p1454_p4 }
  0x4a   : > { %v1150_v0 = vmov 0.0   ;;  %vm1151_vm0 = vmmov 0   ;;  %v990_v1 = vld [vmem:[#allocation5 + $0x8] sm:$0xff]   ;;  %v991_v2 = vld [vmem:[#allocation5] sm:$0xff]   ;;  %v213_v3 = vld [vmem:[%s180_s27] sm:$0xf]  ;;  %v289_v10 = vlaneseq }
  0x4b   : > { %1121 = vsyncadd (%p1455_p6), [#allocation6], 4294967040  ;;  %894 = vmatprep.subr.bf16.mxu0 %v1150_v0  ;;  %898 = vmatprep.mubr.msk.bf16.mxu0 %vm1151_vm0, %v1150_v0  ;;  %vm230_vm1 = vcmask 261120   ;;  %s1152_s18 = smov 104   ;;  %s1153_s20 = smov 120   ;;  %vm632_vm2 = vcmask 60416  }
  0x4c   : > { %895 = vmatpush3.bf16.msra.mxu0 %v990_v1  ;;  %s1154_s17 = smov 96   ;;  %s1155_s22 = smov 112   ;;  %v1156_v8 = vmov 1983009808   ;;  %v1157_v11 = vmov 1934713408  }
  0x4d   : > { %896 = vmatprep.subr.bf16.mxu0 %v1150_v0  ;;  %v287_v9 = vunpack.c.l.s4 %v1156_v8  ;;  %v319_v12 = vunpack.c.l.s4 %v1157_v11  ;;  %v290_v14 = vshrl.u32 %v289_v10, 7  ;;  %s872_s23 = sshll.u32 %s1289_s11, 4  ;;  %s889_s25 = sshll.u32 %s1203_s16, 8 }
  0x4e   : > { %s211_s28 = scalar_lea.vmem [#allocation8], %s872_s23  ;;  %s1346_s8 = scalar_lea.hbm %s1440_s3, %s889_s25 }
  0x4f   : > { %v288_v13 = vunpack.c.0.s8 %v287_v9  ;;  %v320_v17 = vunpack.c.0.s8 %v319_v12  ;;  %s748_s29 = sshll.u32 %s211_s28, 4  ;;  %s719_s7 = scalar_lea.sflag [#allocation9], %s1289_s11  ;;  %s1348_s29 = int_to_ptr.vmem [resolvable:$true] %s748_s29 }
  0x50   : > { %897 = vmatpush3.bf16.msra.mxu0 %v991_v2  ;;  %s1046_s9 = scalar_lea.vmem %s1348_s29, 256  ;;  %p1456_p3 = scmp.ne.s32.totalorder %s1450_s6, 0 }
  0x51   : > { %v1301_v18 = vsub.s32 %v288_v13, %v290_v14  ;;  %v1303_v24 = vsub.s32 %v320_v17, %v290_v14  ;;  %p1047_p8 = scmp.ne.s32.totalorder %s1348_s29, %s1046_s9  ;;  %s1158_s10 = smov [#allocation8]  }
  0x52   : > { %s1050_s21 = sshll.u32 %s1158_s10, 4  ;;  %s1051_s21 = int_to_ptr.vmem [resolvable:$false] %s1050_s21 }
  0x53   : > { %899 = vmatmul.mubr.msk.bf16.vlgmr.msra.gmra.mxu0 %vm230_vm1, %v213_v3  ;;  %p1048_p11 = pnand %p1047_p8, %p1456_p3  ;;  %s1052_s26 = scalar_lea.vmem %s1051_s21, 512 }
  0x54   : > { %p1053_p10 = scmp.lt.s32.totalorder %s1348_s29, %s1051_s21  ;;  %p1054_p2 = scmp.lt.s32.totalorder %s1052_s26, %s1046_s9 }
  0x55   : > { %p1049_p7 = pneg %p1048_p11 }
  0x56   : > { %p1055_p13 = por %p1054_p2, %p1053_p10 }
  0x58   : > { %p1056_p0 = pnand %p1055_p13, %p1049_p7 }
 0x113   : > { %v268_v4 = vpop.f32.mrf.mxu0 }
 0x114   : > { %281 = vrot.lane.b32.xlu1 %v268_v4, %s1152_s18  ;;  %275 = vrot.lane.b32.xlu0 %v268_v4, %s1153_s20 }
 0x115   : > { %v900_v5 = vpop.f32.mrf.mxu0 }
 0x117   : > { %v271_v6 = vpop.f32.mrf.mxu0 }
 0x118   : > { %352 = vrot.lane.b32.xlu1 %v268_v4, %s1154_s17  ;;  %278 = vrot.lane.b32.xlu0 %v268_v4, %s1155_s22 }
 0x119   : > { %v901_v7 = vpop.f32.mrf.mxu0 }
 0x186   : > { %v282_v15 = vpop.permute.xlu1 %281  ;;  %v276_v16 = vpop.permute.xlu0 %275 }
 0x187   : > { %354 = vrot.lane.b32.xlu0 %v276_v16, %s1154_s17  ;;  %v300_v19 = vcombine.low %v276_v16, %v282_v15  ;;  %v301_v20 = vcombine.high %v276_v16, %v282_v15 }
 0x189   : > { %v308_v25 = vrot.slane %v300_v19, %v1301_v18  ;;  %v315_v26 = vrot.slane %v301_v20, %v1301_v18 }
 0x18a   : > { %v279_v21 = vpop.permute.xlu0 %278  ;;  %v353_v59 = vpop.permute.xlu1 %352 }
 0x18b   : > { %v284_v22 = vcombine.low %v268_v4, %v279_v21  ;;  %v285_v23 = vcombine.high %v268_v4, %v279_v21  ;;  %358 = vrot.lane.b32.xlu0 %v282_v15, %s1154_s17  ;;  %356 = vrot.lane.b32.xlu1 %v279_v21, %s1154_s17 }
 0x18d   : > { %v292_v27 = vrot.slane %v284_v22, %v1301_v18  ;;  %v299_v28 = vrot.slane %v285_v23, %v1301_v18 }
 0x18f   : > { %v316_v29 = vcombine.low %v292_v27, %v308_v25  ;;  %v317_v30 = vcombine.high %v292_v27, %v308_v25  ;;  %v332_v31 = vcombine.low %v299_v28, %v315_v26  ;;  %v333_v32 = vcombine.high %v299_v28, %v315_v26 }
 0x191   : > { %v324_v33 = vrot.slane %v316_v29, %v1303_v24  ;;  %v331_v34 = vrot.slane %v317_v30, %v1303_v24  ;;  %v340_v35 = vrot.slane %v332_v31, %v1303_v24  ;;  %v347_v36 = vrot.slane %v333_v32, %v1303_v24 }
 0x193   : > { %v432_v37 = vcombine.low %v324_v33, %v331_v34  ;;  %v877_v38 = vcombine.high %v324_v33, %v331_v34  ;;  %v448_v39 = vcombine.low %v340_v35, %v347_v36  ;;  %v878_v40 = vcombine.high %v340_v35, %v347_v36 }
 0x195   : > { %v439_v41 = vrot.slane %v432_v37, %v1301_v18  ;;  %v447_v42 = vrot.slane %v877_v38, %v1301_v18  ;;  %v455_v43 = vrot.slane %v448_v39, %v1301_v18  ;;  %v463_v44 = vrot.slane %v878_v40, %v1301_v18 }
 0x197   : > { %v465_v45 = vcombine.high %v439_v41, %v447_v42  ;;  %v481_v46 = vcombine.high %v455_v43, %v463_v44  ;;  %v464_v51 = vcombine.low %v439_v41, %v447_v42  ;;  %v480_v52 = vcombine.low %v455_v43, %v463_v44 }
 0x199   : > { %v479_v47 = vrot.slane %v465_v45, %v1303_v24  ;;  %v495_v48 = vrot.slane %v481_v46, %v1303_v24  ;;  %v472_v54 = vrot.slane %v464_v51, %v1303_v24  ;;  %v488_v55 = vrot.slane %v480_v52, %v1303_v24 }
 0x19b   : > { %v498_v49 = vcombine.low %v479_v47, %v495_v48  ;;  %v499_v50 = vcombine.high %v479_v47, %v495_v48  ;;  %v496_v56 = vcombine.low %v472_v54, %v488_v55  ;;  %v497_v57 = vcombine.high %v472_v54, %v488_v55 }
 0x19d   : > { %v983_v53 = vpack.i.bf16 %v499_v50, %v498_v49  ;;  %v976_v58 = vpack.i.bf16 %v497_v57, %v496_v56 }
 0x1a9   : > { %984 = vxpose.xlu0.b32.start.end [1/1] (short) (narrow) %v983_v53, 8 }
 0x1b4   : > { %977 = vxpose.xlu1.b32.start.end [1/1] (short) (narrow) %v976_v58, 8 }
 0x1f9   : > { %v355_v60 = vpop.permute.xlu0 %354 }
 0x1fd   : > { %v357_v61 = vpop.permute.xlu1 %356  ;;  %v359_v62 = vpop.permute.xlu0 %358 }
 0x1fe   : > { %v364_v63 = vcombine.low %v353_v59, %v357_v61  ;;  %v365_v0 = vcombine.high %v353_v59, %v357_v61  ;;  %v380_v1 = vcombine.low %v355_v60, %v359_v62  ;;  %v381_v2 = vcombine.high %v355_v60, %v359_v62 }
 0x200   : > { %v372_v3 = vrot.slane %v364_v63, %v1301_v18  ;;  %v379_v4 = vrot.slane %v365_v0, %v1301_v18  ;;  %v388_v5 = vrot.slane %v380_v1, %v1301_v18  ;;  %v395_v6 = vrot.slane %v381_v2, %v1301_v18 }
 0x202   : > { %v396_v7 = vcombine.low %v372_v3, %v388_v5  ;;  %v397_v8 = vcombine.high %v372_v3, %v388_v5  ;;  %v412_v9 = vcombine.low %v379_v4, %v395_v6  ;;  %v413_v10 = vcombine.high %v379_v4, %v395_v6 }
 0x204   : > { %v404_v11 = vrot.slane %v396_v7, %v1303_v24  ;;  %v411_v12 = vrot.slane %v397_v8, %v1303_v24  ;;  %v420_v13 = vrot.slane %v412_v9, %v1303_v24  ;;  %v427_v14 = vrot.slane %v413_v10, %v1303_v24 }
 0x206   : > { %v637_v15 = vcombine.low %v404_v11, %v411_v12  ;;  %v879_v16 = vcombine.high %v404_v11, %v411_v12  ;;  %v653_v17 = vcombine.low %v420_v13, %v427_v14  ;;  %v880_v19 = vcombine.high %v420_v13, %v427_v14 }
 0x208   : > { %v644_v20 = vrot.slane %v637_v15, %v1301_v18  ;;  %v652_v21 = vrot.slane %v879_v16, %v1301_v18  ;;  %v660_v22 = vrot.slane %v653_v17, %v1301_v18  ;;  %v668_v23 = vrot.slane %v880_v19, %v1301_v18 }
 0x20a   : > { %v669_v25 = vcombine.low %v644_v20, %v652_v21  ;;  %v670_v26 = vcombine.high %v644_v20, %v652_v21  ;;  %v685_v27 = vcombine.low %v660_v22, %v668_v23  ;;  %v686_v28 = vcombine.high %v660_v22, %v668_v23 }
 0x20c   : > { %v677_v29 = vrot.slane %v669_v25, %v1303_v24  ;;  %v684_v30 = vrot.slane %v670_v26, %v1303_v24  ;;  %v693_v31 = vrot.slane %v685_v27, %v1303_v24  ;;  %v700_v32 = vrot.slane %v686_v28, %v1303_v24 }
 0x20e   : > { %v701_v18 = vcombine.low %v677_v29, %v693_v31  ;;  %v702_v33 = vcombine.high %v677_v29, %v693_v31  ;;  %v703_v34 = vcombine.low %v684_v30, %v700_v32  ;;  %v704_v35 = vcombine.high %v684_v30, %v700_v32 }
 0x210   : > { %v705_v36 = vpack.c.bf16 %v701_v18, %v701_v18  ;;  %v706_v37 = vpack.c.bf16 %v702_v33, %v702_v33  ;;  %v707_v38 = vpack.c.bf16 %v703_v34, %v703_v34  ;;  %v708_v39 = vpack.c.bf16 %v704_v35, %v704_v35 }
 0x212   : > { %709 = vst.msk [vmem:[%s211_s28] sm:$0xf] %vm632_vm2, %v705_v36  ;;  %710 = vst.msk [vmem:[%s211_s28 + $0x4] sm:$0xf] %vm632_vm2, %v706_v37 }
 0x213   : > { %711 = vst.msk [vmem:[%s211_s28 + $0x8] sm:$0xf] %vm632_vm2, %v707_v38  ;;  %712 = vst.msk [vmem:[%s211_s28 + $0xc] sm:$0xf] %vm632_vm2, %v708_v39 }
 0x214   : > { %1059 = shalt.err (!%p1056_p0)
}
 0x215   : > { %s1060_s27 = scalar_lea.hbm %s1346_s8, 256  ;;  %s1064_s17 = scalar_lea.hbm %s1440_s3, 512 }
 0x216   : > { %p1061_p5 = scmp.ne.s32.totalorder %s1346_s8, %s1060_s27  ;;  %p1065_p1 = scmp.lt.s32.totalorder %s1346_s8, %s1440_s3 }
 0x217   : > { %p1066_p4 = scmp.lt.s32.totalorder %s1064_s17, %s1060_s27 }
 0x218   : > { %p1062_p9 = pnand %p1061_p5, %p1456_p3 }
 0x219   : > { %p1067_p6 = por %p1066_p4, %p1065_p1 }
 0x21a   : > { %p1063_p12 = pneg %p1062_p9 }
 0x21c   : > { %p1068_p8 = pnand %p1067_p6, %p1063_p12 }
 0x21e   : > { %1071 = shalt.err (!%p1068_p8)
}
 0x21f   : > { %s1159_s30 = smov 64   ;;  %s1160_s4 = smov 4  }
 0x220   : > { %909 = dma.vmem_to_hbm [thread:$0]  (%p1456_p3), %s1348_s29, 256, %s1346_s8, %s719_s7, %s1159_s30, %s1159_s30, %s1160_s4  }
 0x221   : > { %s204_s9 = scalar_lea.vmem [#allocation7], %s872_s23  ;;  %s1389_s7 = scalar_lea.hbm %s1439_s2, %s889_s25 }
 0x222   : > { %s732_s10 = sshll.u32 %s204_s9, 4  ;;  %s714_s23 = scalar_lea.sflag [#allocation4], %s1289_s11  ;;  %s1391_s10 = int_to_ptr.vmem [resolvable:$true] %s732_s10 }
 0x223   : > { %s1072_s21 = scalar_lea.vmem %s1391_s10, 256  ;;  %s1161_s16 = smov [#allocation7]  }
 0x224   : > { %p1073_p11 = scmp.ne.s32.totalorder %s1391_s10, %s1072_s21  ;;  %s1076_s26 = sshll.u32 %s1161_s16, 4  ;;  %s1077_s26 = int_to_ptr.vmem [resolvable:$false] %s1076_s26 }
 0x225   : > { %v985_v24 = vpop.trf.xlu0  ;;  %s1078_s25 = scalar_lea.vmem %s1077_s26, 512  ;;  %p1079_p2 = scmp.lt.s32.totalorder %s1391_s10, %s1077_s26 }
 0x226   : > { %v989_v40 = vunpack.i.h.bf16 %v985_v24  ;;  %v986_v41 = vunpack.i.l.bf16 %v985_v24  ;;  %p1074_p7 = pnand %p1073_p11, %p1456_p3  ;;  %p1080_p13 = scmp.lt.s32.totalorder %s1078_s25, %s1072_s21 }
 0x228   : > { %v631_v42 = vpack.c.bf16 %v989_v40, %v989_v40  ;;  %v630_v43 = vpack.c.bf16 %v986_v41, %v986_v41  ;;  %p1075_p10 = pneg %p1074_p7  ;;  %p1081_p0 = por %p1080_p13, %p1079_p2 }
 0x22a   : > { %636 = vst.msk [vmem:[%s204_s9 + $0xc] sm:$0xf] %vm632_vm2, %v631_v42  ;;  %635 = vst.msk [vmem:[%s204_s9 + $0x8] sm:$0xf] %vm632_vm2, %v630_v43  ;;  %p1082_p5 = pnand %p1081_p0, %p1075_p10 }
 0x230   : > { %v978_v44 = vpop.trf.xlu1 }
 0x231   : > { %v982_v45 = vunpack.i.h.bf16 %v978_v44  ;;  %v979_v46 = vunpack.i.l.bf16 %v978_v44 }
 0x233   : > { %v629_v47 = vpack.c.bf16 %v982_v45, %v982_v45  ;;  %v628_v48 = vpack.c.bf16 %v979_v46, %v979_v46 }
 0x235   : > { %634 = vst.msk [vmem:[%s204_s9 + $0x4] sm:$0xf] %vm632_vm2, %v629_v47  ;;  %633 = vst.msk [vmem:[%s204_s9] sm:$0xf] %vm632_vm2, %v628_v48 }
 0x236   : > { %1085 = shalt.err (!%p1082_p5)
}
 0x237   : > { %s1086_s27 = scalar_lea.hbm %s1389_s7, 256  ;;  %s1090_s20 = scalar_lea.hbm %s1439_s2, 512 }
 0x238   : > { %p1087_p9 = scmp.ne.s32.totalorder %s1389_s7, %s1086_s27  ;;  %p1091_p4 = scmp.lt.s32.totalorder %s1389_s7, %s1439_s2 }
 0x239   : > { %p1092_p6 = scmp.lt.s32.totalorder %s1090_s20, %s1086_s27 }
 0x23a   : > { %p1088_p12 = pnand %p1087_p9, %p1456_p3 }
 0x23b   : > { %p1093_p8 = por %p1092_p6, %p1091_p4 }
 0x23c   : > { %p1089_p1 = pneg %p1088_p12 }
 0x23e   : > { %p1094_p11 = pnand %p1093_p8, %p1089_p1 }
 0x240   : > { %1097 = shalt.err (!%p1094_p11)
}
 0x241   : > { %908 = dma.vmem_to_hbm [thread:$0]  (%p1456_p3), %s1391_s10, 256, %s1389_s7, %s714_s23, %s1159_s30, %s1159_s30, %s1160_s4  }
 0x242 PF: > { %s763_s28 = sand.u32 1, %s1132_s12   ;;  %p1457_p7 = scmp.ne.s32.totalorder %s1446_s19, 0 }
 0x243   : > { %p1458_p10 = scmp.ge.s32.totalorder %s1144_s15, 2  ;;  %s764_s9 = scalar_lea.sflag [#allocation4], %s763_s28 }
 0x245   : > { %p921_p2 = pnand %p1458_p10, %p1457_p7 }
 0x247   : > { %p922_p13 = pneg %p921_p2 }
 0x249   : > { %1123 = dma.done.wait (%p922_p13), %s764_s9, 256  }
 0x24a   : > { %1125 = vsyncadd (%p922_p13), %s764_s9, 4294967040  ;;  %s773_s29 = scalar_lea.sflag [#allocation9], %s763_s28 }
 0x24b   : > { %1127 = dma.done.wait (%p922_p13), %s773_s29, 256  }
 0x24c   : > { %1129 = vsyncadd (%p922_p13), %s773_s29, 4294967040  ;;  %p21_p3 = scmp.ge.s32.totalorder %s1236_s24, 4   ;;  %s1459_s12 = smov %s1136_s13 }
 0x24d   : > { %s1460_s13 = smov %s1140_s14  ;;  %s1461_s14 = smov %s1253_s5 }
 0x24e   : > { %s1462_s15 = smov %s1236_s24  ;;  %23 = sbr.rel (!%p21_p3) target bundleno = 8 (0x8), region = 94 }
 0x253   :  { %778 = vsyncpa [#allocation3], 1 }
 0x254   :  { %780 = vsyncpa [#allocation3 + $0x1], 1 }
 0x255   :  { %781 = vsyncpa [#allocation6], 1 }
 0x256   :  { %782 = vsyncpa [#allocation4], 1 }
 0x257   :  { %784 = vsyncpa [#allocation4 + $0x1], 1 }
 0x258   :  { %785 = vsyncpa [#allocation9], 1 }
 0x259   :  { %787 = vsyncpa [#allocation9 + $0x1], 1 }

</bundles_post_ra>
